<compile_context>
chip_gen: v5e
topology: v5e:2x2
jax: 0.10.0
libtpu: 0.0.40
codegen_flags: <defaults>
</compile_context>

<pallas_src>
import functools

import jax
import jax.numpy as jnp
from jax import lax
from jax.experimental import pallas as pl
from jax.experimental.pallas import tpu as pltpu

LN_EPS = 1e-5
NUM_EXPERTS = 4
TOP_K = 2  # k=2 (hard-coded two-pass arg-top selection in the kernel)
ACT_DTYPE = jnp.bfloat16  # HBM storage dtype for activations / big weights


def bimoa_kernel(x_ref, t_ref, rowp_ref, wdr_ref, ln2_ref, wgate_ref,
                 w1s_ref, b1s_ref, wxt_ref, bpool_ref,
                 out_x_ref, out_t_ref, p_ref, stats_ref, *, m_valid):
    f32 = jnp.float32
    x = x_ref[...].astype(f32)                        # (TM, D)
    t = t_ref[...].astype(f32)
    tm, d = x.shape
    n_experts = wgate_ref.shape[-1]

    rowp = rowp_ref[...]                              # (8, D) packed row params
    g1x, g1t = rowp[0:1, :], rowp[1:2, :]
    b1x, b1t = rowp[2:3, :], rowp[3:4, :]
    shift_x, shift_t = rowp[4:5, :], rowp[5:6, :]

    # --- LayerNorm(2D) over the virtual concat [x, t] (no (TM, 2D) temp) ---
    inv2d = 1.0 / (2.0 * d)
    mu = (jnp.sum(x, axis=-1, keepdims=True)
          + jnp.sum(t, axis=-1, keepdims=True)) * inv2d
    dx = x - mu
    dt = t - mu
    var = (jnp.sum(dx * dx, axis=-1, keepdims=True)
           + jnp.sum(dt * dt, axis=-1, keepdims=True)) * inv2d
    inv_std = lax.rsqrt(var + LN_EPS)
    yx = (dx * inv_std * g1x + b1x).astype(wdr_ref.dtype)
    yt = (dt * inv_std * g1t + b1t).astype(wdr_ref.dtype)

    # --- dimReduction (2D -> D/4): K=2D contraction split into two K=D ---
    y = (jnp.dot(yx, wdr_ref[0], preferred_element_type=f32)
         + jnp.dot(yt, wdr_ref[1], preferred_element_type=f32))      # (TM, d4)

    # --- LayerNorm(D/4) ---
    ln2 = ln2_ref[...]                                               # (2, d4)
    mu2 = jnp.mean(y, axis=-1, keepdims=True)
    yc = y - mu2
    var2 = jnp.mean(yc * yc, axis=-1, keepdims=True)
    y = yc * lax.rsqrt(var2 + LN_EPS) * ln2[0:1, :] + ln2[1:2, :]
    yb = y.astype(w1s_ref.dtype)

    # --- per-task top-2 gating (clean logits / eval mode) ---
    logits = jnp.dot(y, wgate_ref[...], preferred_element_type=f32)  # (TM, E)
    mmax = jnp.max(logits, axis=-1, keepdims=True)
    ez = jnp.exp(logits - mmax)
    probs = ez / jnp.sum(ez, axis=-1, keepdims=True)

    iota = lax.broadcasted_iota(jnp.int32, probs.shape, 1)
    top1 = jnp.max(probs, axis=-1, keepdims=True)
    idx1 = jnp.min(jnp.where(probs == top1, iota, n_experts),
                   axis=-1, keepdims=True)
    onehot1 = iota == idx1
    masked = jnp.where(onehot1, -1.0, probs)
    top2 = jnp.max(masked, axis=-1, keepdims=True)
    idx2 = jnp.min(jnp.where(masked == top2, iota, n_experts),
                   axis=-1, keepdims=True)
    topk_mask = jnp.logical_or(onehot1, iota == idx2)
    topk_probs = jnp.where(topk_mask, probs, 0.0)
    gates = topk_probs / jnp.sum(topk_probs, axis=-1, keepdims=True)  # (TM, E)

    # --- experts: one stacked (TM,d4)x(d4,E*h) matmul; the AdaptiveAvgPool is
    #     folded into a block-diagonal (E*h, 2E) weight + (1, 2E) bias, and the
    #     gate weighting is a VPU multiply + lane reduction (no gexp matmul,
    #     no (TM, d4) moe temp) ---
    hact = jnp.maximum(
        jnp.dot(yb, w1s_ref[...], preferred_element_type=f32) + b1s_ref[...],
        0.0)                                                          # (TM, E*h)
    r = jnp.dot(hact, wxt_ref[...], preferred_element_type=f32)      # (TM, 2E)
    bpool = bpool_ref[...]                                            # (1, 2E)
    px_pre = jnp.sum(gates * (r[:, :n_experts] + bpool[:, :n_experts]),
                     axis=-1, keepdims=True)
    pt_pre = jnp.sum(gates * (r[:, n_experts:] + bpool[:, n_experts:]),
                     axis=-1, keepdims=True)
    px = pl.reciprocal(1.0 + jnp.exp(-px_pre), approx=True)           # sigmoid
    pt = pl.reciprocal(1.0 + jnp.exp(-pt_pre), approx=True)

    # --- scale + per-modal shift ---
    out_x_ref[...] = (px * x + shift_x).astype(out_x_ref.dtype)
    out_t_ref[...] = (pt * t + shift_t).astype(out_t_ref.dtype)
    p_ref[...] = jnp.concatenate([px, pt], axis=-1)                   # (TM, 2)

    # --- per-block MoE balancing stats; rows padded by the wrapper masked out ---
    row = pl.program_id(0) * tm + lax.broadcasted_iota(jnp.int32, (tm, 1), 0)
    valid = (row < m_valid).astype(f32)
    gm = gates * valid
    imp = jnp.sum(gm, axis=0, keepdims=True)                          # (1, E)
    load = jnp.sum((gm > 0.0).astype(f32), axis=0, keepdims=True)
    stats_ref[0] = jnp.concatenate([imp, load], axis=0)               # (2, E)


def _param_spec(arr):
    zeros = (0,) * arr.ndim
    return pl.BlockSpec(arr.shape, lambda i, _z=zeros: _z)


@functools.lru_cache(maxsize=None)
def _chip_config():
    """(vmem_limit_bytes, tensorcores_per_device); chip-aware with fallbacks."""
    kind = ""
    try:
        kind = jax.devices()[0].device_kind.lower()
    except Exception:
        pass
    two_core = any(s in kind for s in ("v7", "v5p", "v4"))
    vmem_cap = (64 << 20) if "v7" in kind else (128 << 20)
    try:
        info = pltpu.get_tpu_info()
        vmem_cap = int(getattr(info, "vmem_capacity_bytes", vmem_cap))
    except Exception:
        pass
    # ~25% physical-VMEM headroom; never request more than ~100 MB scoped VMEM.
    vmem_limit = min((vmem_cap * 3) // 4, 100 << 20)
    return int(vmem_limit), (2 if two_core else 1)


def _row_cap(d, act_bytes, vmem_limit):
    """Largest row tile (multiple of 128) whose pipeline footprint fits VMEM."""
    # 2 inputs + 2 outputs double-buffered in act_bytes, plus ~6 f32 temps.
    per_row = d * (8 * act_bytes + 24) + 64
    cap = vmem_limit // (3 * per_row)
    cap = max(256, min(2048, cap))
    return (cap // 128) * 128


def _tiling(m, num_cores, cap):
    """Row tile TM, grid size G and padded row count (cdiv grid, padded M;
    >=2 blocks only when the chip has >1 TensorCore and M is big enough)."""
    g = -(-m // cap)                                   # cdiv
    if num_cores > 1 and m >= 256 * num_cores:
        g = num_cores * (-(-g // num_cores))           # even split across TCs
    tm = -(-m // g)
    mult = 8 if g == 1 else 128                        # keeps all blocks legal
    tm = -(-tm // mult) * mult
    return tm, g, g * tm


def _cv_squared(v, eps=1e-10):
    if v.shape[0] <= 1:
        return jnp.float32(0.0)
    return jnp.var(v, ddof=1) / (jnp.mean(v) ** 2 + eps)


@functools.partial(jax.jit, static_argnames=("task_index",))
def bimoa_forward(x, t, params, task_index):
    B, N, D = x.shape
    E = NUM_EXPERTS
    M = B * N
    d4 = D // 4
    half = d4 // 2
    f32 = jnp.float32

    act_dtype = ACT_DTYPE
    act_bytes = jnp.dtype(act_dtype).itemsize
    wdtype = ACT_DTYPE

    vmem_limit, num_cores = _chip_config()
    TM, G, M_pad = _tiling(M, num_cores, _row_cap(D, act_bytes, vmem_limit))

    # ---- flatten rows, pad to the tile grid, cast activations to bf16 ----
    x2 = x.reshape(M, D).astype(act_dtype)
    t2 = t.reshape(M, D).astype(act_dtype)
    if M_pad > M:
        x2 = jnp.pad(x2, ((0, M_pad - M), (0, 0)))
        t2 = jnp.pad(t2, ((0, M_pad - M), (0, 0)))

    # ---- pack / pre-transform parameters (trace-time only) ----
    ln1_g, ln1_b = params["ln1_g"], params["ln1_b"]          # (1, 2D)
    shift_x = params["modal_shifts"][2 * task_index + 0][None, :]
    shift_t = params["modal_shifts"][2 * task_index + 1][None, :]
    rowparams = jnp.concatenate(
        [ln1_g[:, :D], ln1_g[:, D:], ln1_b[:, :D], ln1_b[:, D:],
         shift_x, shift_t, jnp.zeros((2, D), f32)], axis=0).astype(f32)  # (8, D)

    wdr3 = params["wdr"].reshape(2, D, d4).astype(wdtype)     # (2, D, d4)
    ln2 = jnp.concatenate([params["ln2_g"], params["ln2_b"]],
                          axis=0).astype(f32)                 # (2, d4)
    wgate = params["w_gate"][task_index].astype(f32)          # (d4, E)

    w1, b1, w2, b2 = params["w1"], params["b1"], params["w2"], params["b2"]
    h = w1.shape[-1]
    Eh = E * h
    w1s = jnp.transpose(w1, (1, 0, 2)).reshape(d4, Eh).astype(wdtype)  # (d4, E*h)
    b1s = b1.reshape(1, Eh).astype(f32)

    # AdaptiveAvgPool1d(1) over each d4/2 chunk folded into the second expert
    # matmul: block-diagonal (E*h, 2E) pooled weight + (1, 2E) pooled bias.
    inv_half = 1.0 / half
    wpool_x = jnp.sum(w2[:, :, :half], axis=-1) * inv_half     # (E, h)
    wpool_t = jnp.sum(w2[:, :, half:], axis=-1) * inv_half
    sel = (jnp.arange(Eh)[:, None] // h
           == jnp.arange(E)[None, :]).astype(f32)              # (Eh, E)
    wxt = jnp.concatenate([sel * wpool_x.reshape(Eh, 1),
                           sel * wpool_t.reshape(Eh, 1)], axis=1).astype(f32)
    bpool = jnp.concatenate(
        [jnp.sum(b2[:, 0, :half], axis=-1) * inv_half,
         jnp.sum(b2[:, 0, half:], axis=-1) * inv_half])[None, :].astype(f32)

    out_shape = (
        jax.ShapeDtypeStruct((M_pad, D), act_dtype),   # out_x (flattened, padded)
        jax.ShapeDtypeStruct((M_pad, D), act_dtype),   # out_t
        jax.ShapeDtypeStruct((M_pad, 2), f32),         # [prompt_x, prompt_t]
        jax.ShapeDtypeStruct((G, 2, E), f32),          # [importance; load] / block
    )

    row_spec = pl.BlockSpec((TM, D), lambda i: (i, 0))
    in_specs = [
        row_spec, row_spec,
        _param_spec(rowparams), _param_spec(wdr3), _param_spec(ln2),
        _param_spec(wgate), _param_spec(w1s), _param_spec(b1s),
        _param_spec(wxt), _param_spec(bpool),
    ]
    out_specs = (
        row_spec, row_spec,
        pl.BlockSpec((TM, 2), lambda i: (i, 0)),
        pl.BlockSpec((1, 2, E), lambda i: (i, 0, 0)),
    )

    # Advisory cost estimate for XLA scheduling of surrounding ops.
    flops = int(2 * M_pad * (2 * D * d4 + d4 * E + d4 * Eh + Eh * 2 * E)
                + 12 * M_pad * D)
    transcendentals = int(M_pad * (E + 4))
    param_bytes = int(4 * (8 * D + 2 * d4 + d4 * E + Eh + Eh * 2 * E + 2 * E)
                      + act_bytes * (2 * D * d4 + d4 * Eh))
    bytes_accessed = int(4 * M_pad * D * act_bytes + 8 * M_pad
                         + 8 * G * E + param_bytes)

    out_x2, out_t2, p2, stats = pl.pallas_call(
        functools.partial(bimoa_kernel, m_valid=M),
        out_shape=out_shape,
        grid_spec=pltpu.PrefetchScalarGridSpec(
            num_scalar_prefetch=0,
            grid=(G,),
            in_specs=in_specs,
            out_specs=out_specs,
        ),
        compiler_params=pltpu.CompilerParams(
            dimension_semantics=("parallel",),
            vmem_limit_bytes=int(vmem_limit)),
        cost_estimate=pl.CostEstimate(
            flops=flops,
            transcendentals=transcendentals,
            bytes_accessed=bytes_accessed),
    )(x2, t2, rowparams, wdr3, ln2, wgate, w1s, b1s, wxt, bpool)

    out_x = out_x2[:M].reshape(B, N, D)
    out_t = out_t2[:M].reshape(B, N, D)
    px = p2[:M, 0:1].reshape(B, N, 1)
    pt = p2[:M, 1:2].reshape(B, N, 1)

    importance = jnp.sum(stats[:, 0, :], axis=0)               # (E,)
    load = jnp.sum(stats[:, 1, :], axis=0)                     # (E,)
    aux_loss = (_cv_squared(importance) + _cv_squared(load)) * 1e-2

    return out_x, out_t, px, pt, aux_loss


def init_params(key, dim=128, task_num=3, num_experts=NUM_EXPERTS):
    d4 = dim // 4
    h = dim // 32
    ks = jax.random.split(key, 8)

    # dimReduction: xavier_uniform on (d4, 2*dim), stored transposed.
    bound_dr = (6.0 / (2 * dim + d4)) ** 0.5
    wdr = jax.random.uniform(ks[0], (2 * dim, d4), jnp.float32, -bound_dr, bound_dr)

    # modal_shifts: 2*task_num vectors, normal(std=0.02).
    modal_shifts = 0.02 * jax.random.normal(ks[1], (2 * task_num, dim), jnp.float32)

    # per-task gate weights (small random instead of zeros to avoid degenerate ties).
    w_gate = 0.02 * jax.random.normal(ks[2], (task_num, d4, num_experts), jnp.float32)

    # expert MLPs (nn.Linear-style uniform init).
    b_in = 1.0 / (d4 ** 0.5)
    b_hid = 1.0 / (h ** 0.5)
    w1 = jax.random.uniform(ks[3], (num_experts, d4, h), jnp.float32, -b_in, b_in)
    b1 = jax.random.uniform(ks[4], (num_experts, 1, h), jnp.float32, -b_in, b_in)
    w2 = jax.random.uniform(ks[5], (num_experts, h, d4), jnp.float32, -b_hid, b_hid)
    b2 = jax.random.uniform(ks[6], (num_experts, 1, d4), jnp.float32, -b_hid, b_hid)

    return dict(
        ln1_g=jnp.ones((1, 2 * dim), jnp.float32),
        ln1_b=jnp.zeros((1, 2 * dim), jnp.float32),
        ln2_g=jnp.ones((1, d4), jnp.float32),
        ln2_b=jnp.zeros((1, d4), jnp.float32),
        wdr=wdr, modal_shifts=modal_shifts, w_gate=w_gate,
        w1=w1, b1=b1, w2=w2, b2=b2,
    )


if __name__ == "__main__":
    dim, B, N = 128, 2, 8
    key = jax.random.PRNGKey(0)
    kx, kt, kp = jax.random.split(key, 3)
    x = jax.random.normal(kx, (B, N, dim), jnp.float32)
    t = jax.random.normal(kt, (B, N, dim), jnp.float32)
    params = init_params(kp, dim=dim)

    out_x, out_t, px, pt, aux = bimoa_forward(x, t, params, task_index=1)
    jax.block_until_ready((out_x, out_t, px, pt, aux))

    assert out_x.shape == (B, N, dim) and out_t.shape == (B, N, dim)
    assert px.shape == (B, N, 1) and pt.shape == (B, N, 1)
    assert bool(jnp.isfinite(aux))
    print("KERNEL_OK")
</pallas_src>

<mosaic_0001>
module attributes {stable_mosaic.version = 11 : i64} {
  func.func @bimoa_kernel(%arg0: i32, %arg1: memref<16x128xbf16, #tpu.memory_space<vmem>>, %arg2: memref<16x128xbf16, #tpu.memory_space<vmem>>, %arg3: memref<8x128xf32, #tpu.memory_space<vmem>>, %arg4: memref<2x128x32xbf16, #tpu.memory_space<vmem>>, %arg5: memref<2x32xf32, #tpu.memory_space<vmem>>, %arg6: memref<32x4xf32, #tpu.memory_space<vmem>>, %arg7: memref<32x16xbf16, #tpu.memory_space<vmem>>, %arg8: memref<1x16xf32, #tpu.memory_space<vmem>>, %arg9: memref<16x8xf32, #tpu.memory_space<vmem>>, %arg10: memref<1x8xf32, #tpu.memory_space<vmem>>, %arg11: memref<16x128xbf16, #tpu.memory_space<vmem>>, %arg12: memref<16x128xbf16, #tpu.memory_space<vmem>>, %arg13: memref<16x2xf32, #tpu.memory_space<vmem>>, %arg14: memref<1x2x4xf32, #tpu.memory_space<vmem>>) attributes {dimension_semantics = [#tpu.dimension_semantics<parallel>], iteration_bounds = array<i64: 1>, scalar_prefetch = 0 : i64, scratch_operands = 0 : i64, tpu.core_type = #tpu.core_type<tc>, window_params = [{transform_indices = @transform_0, window_bounds = array<i64: 16, 128>}, {transform_indices = @transform_1, window_bounds = array<i64: 16, 128>}, {pipeline_mode = #tpu.pipeline_mode<synchronous>, transform_indices = @transform_2, window_bounds = array<i64: 8, 128>}, {pipeline_mode = #tpu.pipeline_mode<synchronous>, transform_indices = @transform_3, window_bounds = array<i64: 2, 128, 32>}, {pipeline_mode = #tpu.pipeline_mode<synchronous>, transform_indices = @transform_4, window_bounds = array<i64: 2, 32>}, {pipeline_mode = #tpu.pipeline_mode<synchronous>, transform_indices = @transform_5, window_bounds = array<i64: 32, 4>}, {pipeline_mode = #tpu.pipeline_mode<synchronous>, transform_indices = @transform_6, window_bounds = array<i64: 32, 16>}, {pipeline_mode = #tpu.pipeline_mode<synchronous>, transform_indices = @transform_7, window_bounds = array<i64: 1, 16>}, {pipeline_mode = #tpu.pipeline_mode<synchronous>, transform_indices = @transform_8, window_bounds = array<i64: 16, 8>}, {pipeline_mode = #tpu.pipeline_mode<synchronous>, transform_indices = @transform_9, window_bounds = array<i64: 1, 8>}, {transform_indices = @transform_10, window_bounds = array<i64: 16, 128>}, {transform_indices = @transform_11, window_bounds = array<i64: 16, 128>}, {transform_indices = @transform_12, window_bounds = array<i64: 16, 2>}, {transform_indices = @transform_13, window_bounds = array<i64: 1, 2, 4>}]} {
    %c0 = arith.constant 0 : index
    %c0_0 = arith.constant 0 : index
    %0 = vector.load %arg1[%c0, %c0_0] : memref<16x128xbf16, #tpu.memory_space<vmem>>, vector<16x128xbf16>
    %1 = arith.extf %0 : vector<16x128xbf16> to vector<16x128xf32>
    %c0_1 = arith.constant 0 : index
    %c0_2 = arith.constant 0 : index
    %2 = vector.load %arg2[%c0_1, %c0_2] : memref<16x128xbf16, #tpu.memory_space<vmem>>, vector<16x128xbf16>
    %3 = arith.extf %2 : vector<16x128xbf16> to vector<16x128xf32>
    %c0_3 = arith.constant 0 : index
    %c0_4 = arith.constant 0 : index
    %4 = vector.load %arg3[%c0_3, %c0_4] : memref<8x128xf32, #tpu.memory_space<vmem>>, vector<8x128xf32>
    %5 = vector.extract_strided_slice %4 {offsets = [0, 0], sizes = [1, 128], strides = [1, 1]} : vector<8x128xf32> to vector<1x128xf32>
    %6 = vector.extract_strided_slice %4 {offsets = [1, 0], sizes = [1, 128], strides = [1, 1]} : vector<8x128xf32> to vector<1x128xf32>
    %7 = vector.extract_strided_slice %4 {offsets = [2, 0], sizes = [1, 128], strides = [1, 1]} : vector<8x128xf32> to vector<1x128xf32>
    %8 = vector.extract_strided_slice %4 {offsets = [3, 0], sizes = [1, 128], strides = [1, 1]} : vector<8x128xf32> to vector<1x128xf32>
    %9 = vector.extract_strided_slice %4 {offsets = [4, 0], sizes = [1, 128], strides = [1, 1]} : vector<8x128xf32> to vector<1x128xf32>
    %10 = vector.extract_strided_slice %4 {offsets = [5, 0], sizes = [1, 128], strides = [1, 1]} : vector<8x128xf32> to vector<1x128xf32>
    %cst = arith.constant dense<0.000000e+00> : vector<16xf32>
    %11 = vector.multi_reduction <add>, %1, %cst [1] : vector<16x128xf32> to vector<16xf32>
    %12 = vector.shape_cast %11 : vector<16xf32> to vector<16x1xf32>
    %cst_5 = arith.constant dense<0.000000e+00> : vector<16xf32>
    %13 = vector.multi_reduction <add>, %3, %cst_5 [1] : vector<16x128xf32> to vector<16xf32>
    %14 = vector.shape_cast %13 : vector<16xf32> to vector<16x1xf32>
    %15 = arith.addf %12, %14 : vector<16x1xf32>
    %cst_6 = arith.constant 3.906250e-03 : f32
    %16 = vector.broadcast %cst_6 : f32 to vector<16x1xf32>
    %17 = arith.mulf %15, %16 : vector<16x1xf32>
    %18 = vector.broadcast %17 : vector<16x1xf32> to vector<16x128xf32>
    %19 = arith.subf %1, %18 : vector<16x128xf32>
    %20 = vector.broadcast %17 : vector<16x1xf32> to vector<16x128xf32>
    %21 = arith.subf %3, %20 : vector<16x128xf32>
    %22 = arith.mulf %19, %19 : vector<16x128xf32>
    %cst_7 = arith.constant dense<0.000000e+00> : vector<16xf32>
    %23 = vector.multi_reduction <add>, %22, %cst_7 [1] : vector<16x128xf32> to vector<16xf32>
    %24 = vector.shape_cast %23 : vector<16xf32> to vector<16x1xf32>
    %25 = arith.mulf %21, %21 : vector<16x128xf32>
    %cst_8 = arith.constant dense<0.000000e+00> : vector<16xf32>
    %26 = vector.multi_reduction <add>, %25, %cst_8 [1] : vector<16x128xf32> to vector<16xf32>
    %27 = vector.shape_cast %26 : vector<16xf32> to vector<16x1xf32>
    %28 = arith.addf %24, %27 : vector<16x1xf32>
    %cst_9 = arith.constant 3.906250e-03 : f32
    %29 = vector.broadcast %cst_9 : f32 to vector<16x1xf32>
    %30 = arith.mulf %28, %29 : vector<16x1xf32>
    %cst_10 = arith.constant 9.99999974E-6 : f32
    %31 = vector.broadcast %cst_10 : f32 to vector<16x1xf32>
    %32 = arith.addf %30, %31 : vector<16x1xf32>
    %33 = math.rsqrt %32 : vector<16x1xf32>
    %34 = vector.broadcast %33 : vector<16x1xf32> to vector<16x128xf32>
    %35 = arith.mulf %19, %34 : vector<16x128xf32>
    %36 = vector.broadcast %5 : vector<1x128xf32> to vector<16x128xf32>
    %37 = arith.mulf %35, %36 : vector<16x128xf32>
    %38 = vector.broadcast %7 : vector<1x128xf32> to vector<16x128xf32>
    %39 = arith.addf %37, %38 : vector<16x128xf32>
    %40 = arith.truncf %39 : vector<16x128xf32> to vector<16x128xbf16>
    %41 = vector.broadcast %33 : vector<16x1xf32> to vector<16x128xf32>
    %42 = arith.mulf %21, %41 : vector<16x128xf32>
    %43 = vector.broadcast %6 : vector<1x128xf32> to vector<16x128xf32>
    %44 = arith.mulf %42, %43 : vector<16x128xf32>
    %45 = vector.broadcast %8 : vector<1x128xf32> to vector<16x128xf32>
    %46 = arith.addf %44, %45 : vector<16x128xf32>
    %47 = arith.truncf %46 : vector<16x128xf32> to vector<16x128xbf16>
    %c0_11 = arith.constant 0 : index
    %c0_12 = arith.constant 0 : index
    %c0_13 = arith.constant 0 : index
    %48 = vector.load %arg4[%c0_11, %c0_12, %c0_13] : memref<2x128x32xbf16, #tpu.memory_space<vmem>>, vector<1x128x32xbf16>
    %49 = vector.shape_cast %48 : vector<1x128x32xbf16> to vector<128x32xbf16>
    %cst_14 = arith.constant dense<0.000000e+00> : vector<16x32xf32>
    %50 = tpu.matmul %40, %49, %cst_14 {dimension_numbers = #tpu.dot_dimension_numbers<[1], [0], [0], [1], [0, 0, 1, 1], [], []>} : vector<16x128xbf16>, vector<128x32xbf16>, vector<16x32xf32> -> vector<16x32xf32>
    %c1 = arith.constant 1 : index
    %c0_15 = arith.constant 0 : index
    %c0_16 = arith.constant 0 : index
    %51 = vector.load %arg4[%c1, %c0_15, %c0_16] : memref<2x128x32xbf16, #tpu.memory_space<vmem>>, vector<1x128x32xbf16>
    %52 = vector.shape_cast %51 : vector<1x128x32xbf16> to vector<128x32xbf16>
    %cst_17 = arith.constant dense<0.000000e+00> : vector<16x32xf32>
    %53 = tpu.matmul %47, %52, %cst_17 {dimension_numbers = #tpu.dot_dimension_numbers<[1], [0], [0], [1], [0, 0, 1, 1], [], []>} : vector<16x128xbf16>, vector<128x32xbf16>, vector<16x32xf32> -> vector<16x32xf32>
    %54 = arith.addf %50, %53 : vector<16x32xf32>
    %c0_18 = arith.constant 0 : index
    %c0_19 = arith.constant 0 : index
    %55 = vector.load %arg5[%c0_18, %c0_19] : memref<2x32xf32, #tpu.memory_space<vmem>>, vector<2x32xf32>
    %cst_20 = arith.constant dense<0.000000e+00> : vector<16xf32>
    %56 = vector.multi_reduction <add>, %54, %cst_20 [1] : vector<16x32xf32> to vector<16xf32>
    %57 = vector.shape_cast %56 : vector<16xf32> to vector<16x1xf32>
    %cst_21 = arith.constant 3.200000e+01 : f32
    %58 = vector.broadcast %cst_21 : f32 to vector<16x1xf32>
    %59 = arith.divf %57, %58 : vector<16x1xf32>
    %60 = vector.broadcast %59 : vector<16x1xf32> to vector<16x32xf32>
    %61 = arith.subf %54, %60 : vector<16x32xf32>
    %62 = arith.mulf %61, %61 : vector<16x32xf32>
    %cst_22 = arith.constant dense<0.000000e+00> : vector<16xf32>
    %63 = vector.multi_reduction <add>, %62, %cst_22 [1] : vector<16x32xf32> to vector<16xf32>
    %64 = vector.shape_cast %63 : vector<16xf32> to vector<16x1xf32>
    %cst_23 = arith.constant 3.200000e+01 : f32
    %65 = vector.broadcast %cst_23 : f32 to vector<16x1xf32>
    %66 = arith.divf %64, %65 : vector<16x1xf32>
    %cst_24 = arith.constant 9.99999974E-6 : f32
    %67 = vector.broadcast %cst_24 : f32 to vector<16x1xf32>
    %68 = arith.addf %66, %67 : vector<16x1xf32>
    %69 = math.rsqrt %68 : vector<16x1xf32>
    %70 = vector.broadcast %69 : vector<16x1xf32> to vector<16x32xf32>
    %71 = arith.mulf %61, %70 : vector<16x32xf32>
    %72 = vector.extract_strided_slice %55 {offsets = [0, 0], sizes = [1, 32], strides = [1, 1]} : vector<2x32xf32> to vector<1x32xf32>
    %73 = vector.broadcast %72 : vector<1x32xf32> to vector<16x32xf32>
    %74 = arith.mulf %71, %73 : vector<16x32xf32>
    %75 = vector.extract_strided_slice %55 {offsets = [1, 0], sizes = [1, 32], strides = [1, 1]} : vector<2x32xf32> to vector<1x32xf32>
    %76 = vector.broadcast %75 : vector<1x32xf32> to vector<16x32xf32>
    %77 = arith.addf %74, %76 : vector<16x32xf32>
    %78 = arith.truncf %77 : vector<16x32xf32> to vector<16x32xbf16>
    %c0_25 = arith.constant 0 : index
    %c0_26 = arith.constant 0 : index
    %79 = vector.load %arg6[%c0_25, %c0_26] : memref<32x4xf32, #tpu.memory_space<vmem>>, vector<32x4xf32>
    %cst_27 = arith.constant dense<0.000000e+00> : vector<16x4xf32>
    %80 = tpu.matmul %77, %79, %cst_27 {dimension_numbers = #tpu.dot_dimension_numbers<[1], [0], [0], [1], [0, 0, 1, 1], [], []>} : vector<16x32xf32>, vector<32x4xf32>, vector<16x4xf32> -> vector<16x4xf32>
    %cst_28 = arith.constant dense<0xFF800000> : vector<16xf32>
    %81 = vector.multi_reduction <maximumf>, %80, %cst_28 [1] : vector<16x4xf32> to vector<16xf32>
    %82 = vector.shape_cast %81 : vector<16xf32> to vector<16x1xf32>
    %83 = vector.broadcast %82 : vector<16x1xf32> to vector<16x4xf32>
    %84 = arith.subf %80, %83 : vector<16x4xf32>
    %85 = math.exp %84 : vector<16x4xf32>
    %cst_29 = arith.constant dense<0.000000e+00> : vector<16xf32>
    %86 = vector.multi_reduction <add>, %85, %cst_29 [1] : vector<16x4xf32> to vector<16xf32>
    %87 = vector.shape_cast %86 : vector<16xf32> to vector<16x1xf32>
    %88 = vector.broadcast %87 : vector<16x1xf32> to vector<16x4xf32>
    %89 = arith.divf %85, %88 : vector<16x4xf32>
    %90 = tpu.iota {dimensions = array<i32: 1>} : vector<16x4xi32>
    %cst_30 = arith.constant dense<0xFF800000> : vector<16xf32>
    %91 = vector.multi_reduction <maximumf>, %89, %cst_30 [1] : vector<16x4xf32> to vector<16xf32>
    %92 = vector.shape_cast %91 : vector<16xf32> to vector<16x1xf32>
    %93 = vector.broadcast %92 : vector<16x1xf32> to vector<16x4xf32>
    %94 = arith.cmpf oeq, %89, %93 : vector<16x4xf32>
    %c4_i32 = arith.constant 4 : i32
    %95 = vector.broadcast %c4_i32 : i32 to vector<16x4xi32>
    %96 = arith.select %94, %90, %95 : vector<16x4xi1>, vector<16x4xi32>
    %cst_31 = arith.constant dense<2147483647> : vector<16xi32>
    %97 = vector.multi_reduction <minsi>, %96, %cst_31 [1] : vector<16x4xi32> to vector<16xi32>
    %98 = vector.shape_cast %97 : vector<16xi32> to vector<16x1xi32>
    %99 = vector.broadcast %98 : vector<16x1xi32> to vector<16x4xi32>
    %100 = arith.cmpi eq, %90, %99 : vector<16x4xi32>
    %cst_32 = arith.constant -1.000000e+00 : f32
    %101 = vector.broadcast %cst_32 : f32 to vector<16x4xf32>
    %102 = arith.select %100, %101, %89 : vector<16x4xi1>, vector<16x4xf32>
    %cst_33 = arith.constant dense<0xFF800000> : vector<16xf32>
    %103 = vector.multi_reduction <maximumf>, %102, %cst_33 [1] : vector<16x4xf32> to vector<16xf32>
    %104 = vector.shape_cast %103 : vector<16xf32> to vector<16x1xf32>
    %105 = vector.broadcast %104 : vector<16x1xf32> to vector<16x4xf32>
    %106 = arith.cmpf oeq, %102, %105 : vector<16x4xf32>
    %c4_i32_34 = arith.constant 4 : i32
    %107 = vector.broadcast %c4_i32_34 : i32 to vector<16x4xi32>
    %108 = arith.select %106, %90, %107 : vector<16x4xi1>, vector<16x4xi32>
    %cst_35 = arith.constant dense<2147483647> : vector<16xi32>
    %109 = vector.multi_reduction <minsi>, %108, %cst_35 [1] : vector<16x4xi32> to vector<16xi32>
    %110 = vector.shape_cast %109 : vector<16xi32> to vector<16x1xi32>
    %111 = vector.broadcast %110 : vector<16x1xi32> to vector<16x4xi32>
    %112 = arith.cmpi eq, %90, %111 : vector<16x4xi32>
    %113 = arith.ori %100, %112 : vector<16x4xi1>
    %cst_36 = arith.constant 0.000000e+00 : f32
    %114 = vector.broadcast %cst_36 : f32 to vector<16x4xf32>
    %115 = arith.select %113, %89, %114 : vector<16x4xi1>, vector<16x4xf32>
    %cst_37 = arith.constant dense<0.000000e+00> : vector<16xf32>
    %116 = vector.multi_reduction <add>, %115, %cst_37 [1] : vector<16x4xf32> to vector<16xf32>
    %117 = vector.shape_cast %116 : vector<16xf32> to vector<16x1xf32>
    %118 = vector.broadcast %117 : vector<16x1xf32> to vector<16x4xf32>
    %119 = arith.divf %115, %118 : vector<16x4xf32>
    %c0_38 = arith.constant 0 : index
    %c0_39 = arith.constant 0 : index
    %120 = vector.load %arg7[%c0_38, %c0_39] : memref<32x16xbf16, #tpu.memory_space<vmem>>, vector<32x16xbf16>
    %cst_40 = arith.constant dense<0.000000e+00> : vector<16x16xf32>
    %121 = tpu.matmul %78, %120, %cst_40 {dimension_numbers = #tpu.dot_dimension_numbers<[1], [0], [0], [1], [0, 0, 1, 1], [], []>} : vector<16x32xbf16>, vector<32x16xbf16>, vector<16x16xf32> -> vector<16x16xf32>
    %c0_41 = arith.constant 0 : index
    %c0_42 = arith.constant 0 : index
    %122 = vector.load %arg8[%c0_41, %c0_42] : memref<1x16xf32, #tpu.memory_space<vmem>>, vector<1x16xf32>
    %123 = vector.broadcast %122 : vector<1x16xf32> to vector<16x16xf32>
    %124 = arith.addf %121, %123 : vector<16x16xf32>
    %cst_43 = arith.constant 0.000000e+00 : f32
    %125 = vector.broadcast %cst_43 : f32 to vector<16x16xf32>
    %126 = arith.maximumf %124, %125 : vector<16x16xf32>
    %c0_44 = arith.constant 0 : index
    %c0_45 = arith.constant 0 : index
    %127 = vector.load %arg9[%c0_44, %c0_45] : memref<16x8xf32, #tpu.memory_space<vmem>>, vector<16x8xf32>
    %cst_46 = arith.constant dense<0.000000e+00> : vector<16x8xf32>
    %128 = tpu.matmul %126, %127, %cst_46 {dimension_numbers = #tpu.dot_dimension_numbers<[1], [0], [0], [1], [0, 0, 1, 1], [], []>} : vector<16x16xf32>, vector<16x8xf32>, vector<16x8xf32> -> vector<16x8xf32>
    %c0_47 = arith.constant 0 : index
    %c0_48 = arith.constant 0 : index
    %129 = vector.load %arg10[%c0_47, %c0_48] : memref<1x8xf32, #tpu.memory_space<vmem>>, vector<1x8xf32>
    %130 = vector.extract_strided_slice %128 {offsets = [0, 0], sizes = [16, 4], strides = [1, 1]} : vector<16x8xf32> to vector<16x4xf32>
    %131 = vector.extract_strided_slice %129 {offsets = [0, 0], sizes = [1, 4], strides = [1, 1]} : vector<1x8xf32> to vector<1x4xf32>
    %132 = vector.broadcast %131 : vector<1x4xf32> to vector<16x4xf32>
    %133 = arith.addf %130, %132 : vector<16x4xf32>
    %134 = arith.mulf %119, %133 : vector<16x4xf32>
    %cst_49 = arith.constant dense<0.000000e+00> : vector<16xf32>
    %135 = vector.multi_reduction <add>, %134, %cst_49 [1] : vector<16x4xf32> to vector<16xf32>
    %136 = vector.shape_cast %135 : vector<16xf32> to vector<16x1xf32>
    %137 = vector.extract_strided_slice %128 {offsets = [0, 4], sizes = [16, 4], strides = [1, 1]} : vector<16x8xf32> to vector<16x4xf32>
    %138 = vector.extract_strided_slice %129 {offsets = [0, 4], sizes = [1, 4], strides = [1, 1]} : vector<1x8xf32> to vector<1x4xf32>
    %139 = vector.broadcast %138 : vector<1x4xf32> to vector<16x4xf32>
    %140 = arith.addf %137, %139 : vector<16x4xf32>
    %141 = arith.mulf %119, %140 : vector<16x4xf32>
    %cst_50 = arith.constant dense<0.000000e+00> : vector<16xf32>
    %142 = vector.multi_reduction <add>, %141, %cst_50 [1] : vector<16x4xf32> to vector<16xf32>
    %143 = vector.shape_cast %142 : vector<16xf32> to vector<16x1xf32>
    %cst_51 = arith.constant 0.000000e+00 : f32
    %144 = vector.broadcast %cst_51 : f32 to vector<16x1xf32>
    %145 = arith.subf %144, %136 : vector<16x1xf32>
    %146 = math.exp %145 : vector<16x1xf32>
    %cst_52 = arith.constant 1.000000e+00 : f32
    %147 = vector.broadcast %cst_52 : f32 to vector<16x1xf32>
    %148 = arith.addf %147, %146 : vector<16x1xf32>
    %149 = tpu.reciprocal %148 {approx = true} : vector<16x1xf32> -> vector<16x1xf32>
    %cst_53 = arith.constant 0.000000e+00 : f32
    %150 = vector.broadcast %cst_53 : f32 to vector<16x1xf32>
    %151 = arith.subf %150, %143 : vector<16x1xf32>
    %152 = math.exp %151 : vector<16x1xf32>
    %cst_54 = arith.constant 1.000000e+00 : f32
    %153 = vector.broadcast %cst_54 : f32 to vector<16x1xf32>
    %154 = arith.addf %153, %152 : vector<16x1xf32>
    %155 = tpu.reciprocal %154 {approx = true} : vector<16x1xf32> -> vector<16x1xf32>
    %156 = vector.broadcast %149 : vector<16x1xf32> to vector<16x128xf32>
    %157 = arith.mulf %156, %1 : vector<16x128xf32>
    %158 = vector.broadcast %9 : vector<1x128xf32> to vector<16x128xf32>
    %159 = arith.addf %157, %158 : vector<16x128xf32>
    %160 = arith.truncf %159 : vector<16x128xf32> to vector<16x128xbf16>
    %c0_55 = arith.constant 0 : index
    %c0_56 = arith.constant 0 : index
    %161 = vector.load %arg11[%c0_55, %c0_56] : memref<16x128xbf16, #tpu.memory_space<vmem>>, vector<16x128xbf16>
    tpu.vector_store %arg11[%c0_55, %c0_56], %160 {strides = array<i32>} : memref<16x128xbf16, #tpu.memory_space<vmem>>, vector<16x128xbf16>,
    %162 = vector.broadcast %155 : vector<16x1xf32> to vector<16x128xf32>
    %163 = arith.mulf %162, %3 : vector<16x128xf32>
    %164 = vector.broadcast %10 : vector<1x128xf32> to vector<16x128xf32>
    %165 = arith.addf %163, %164 : vector<16x128xf32>
    %166 = arith.truncf %165 : vector<16x128xf32> to vector<16x128xbf16>
    %c0_57 = arith.constant 0 : index
    %c0_58 = arith.constant 0 : index
    %167 = vector.load %arg12[%c0_57, %c0_58] : memref<16x128xbf16, #tpu.memory_space<vmem>>, vector<16x128xbf16>
    tpu.vector_store %arg12[%c0_57, %c0_58], %166 {strides = array<i32>} : memref<16x128xbf16, #tpu.memory_space<vmem>>, vector<16x128xbf16>,
    %168 = tpu.concatenate %149, %155 in 1 : vector<16x1xf32>, vector<16x1xf32> -> vector<16x2xf32>
    %c0_59 = arith.constant 0 : index
    %c0_60 = arith.constant 0 : index
    %169 = vector.load %arg13[%c0_59, %c0_60] : memref<16x2xf32, #tpu.memory_space<vmem>>, vector<16x2xf32>
    tpu.vector_store %arg13[%c0_59, %c0_60], %168 {strides = array<i32>} : memref<16x2xf32, #tpu.memory_space<vmem>>, vector<16x2xf32>,
    %c16_i32 = arith.constant 16 : i32
    %170 = arith.muli %arg0, %c16_i32 : i32
    %171 = tpu.iota {dimensions = array<i32: 0>} : vector<16x1xi32>
    %172 = vector.broadcast %170 : i32 to vector<16x1xi32>
    %173 = arith.addi %172, %171 : vector<16x1xi32>
    %c16_i32_61 = arith.constant 16 : i32
    %174 = vector.broadcast %c16_i32_61 : i32 to vector<16x1xi32>
    %175 = arith.cmpi slt, %173, %174 : vector<16x1xi32>
    %176 = arith.extui %175 : vector<16x1xi1> to vector<16x1xi32>
    %177 = arith.sitofp %176 : vector<16x1xi32> to vector<16x1xf32>
    %178 = vector.broadcast %177 : vector<16x1xf32> to vector<16x4xf32>
    %179 = arith.mulf %119, %178 : vector<16x4xf32>
    %cst_62 = arith.constant dense<0.000000e+00> : vector<4xf32>
    %180 = vector.multi_reduction <add>, %179, %cst_62 [0] : vector<16x4xf32> to vector<4xf32>
    %181 = vector.shape_cast %180 : vector<4xf32> to vector<1x4xf32>
    %cst_63 = arith.constant 0.000000e+00 : f32
    %182 = vector.broadcast %cst_63 : f32 to vector<16x4xf32>
    %183 = arith.cmpf ogt, %179, %182 : vector<16x4xf32>
    %184 = arith.extui %183 : vector<16x4xi1> to vector<16x4xi32>
    %185 = arith.sitofp %184 : vector<16x4xi32> to vector<16x4xf32>
    %cst_64 = arith.constant dense<0.000000e+00> : vector<4xf32>
    %186 = vector.multi_reduction <add>, %185, %cst_64 [0] : vector<16x4xf32> to vector<4xf32>
    %187 = vector.shape_cast %186 : vector<4xf32> to vector<1x4xf32>
    %188 = tpu.concatenate %181, %187 in 0 : vector<1x4xf32>, vector<1x4xf32> -> vector<2x4xf32>
    %c0_65 = arith.constant 0 : index
    %c0_66 = arith.constant 0 : index
    %c0_67 = arith.constant 0 : index
    %189 = vector.load %arg14[%c0_65, %c0_66, %c0_67] : memref<1x2x4xf32, #tpu.memory_space<vmem>>, vector<1x2x4xf32>
    %190 = vector.shape_cast %189 : vector<1x2x4xf32> to vector<2x4xf32>
    %191 = vector.shape_cast %188 : vector<2x4xf32> to vector<1x2x4xf32>
    tpu.vector_store %arg14[%c0_65, %c0_66, %c0_67], %191 {strides = array<i32>} : memref<1x2x4xf32, #tpu.memory_space<vmem>>, vector<1x2x4xf32>,
    return
  }
  func.func @transform_0(%arg0: i32) -> (i32, i32) {
    %c0_i32 = arith.constant 0 : i32
    %c0_i32_0 = arith.constant 0 : i32
    return %arg0, %c0_i32 : i32, i32
  }
  func.func @transform_1(%arg0: i32) -> (i32, i32) {
    %c0_i32 = arith.constant 0 : i32
    %c0_i32_0 = arith.constant 0 : i32
    return %arg0, %c0_i32 : i32, i32
  }
  func.func @transform_2(%arg0: i32) -> (i32, i32) {
    %c0_i32 = arith.constant 0 : i32
    %c0_i32_0 = arith.constant 0 : i32
    %c0_i32_1 = arith.constant 0 : i32
    return %c0_i32, %c0_i32_0 : i32, i32
  }
  func.func @transform_3(%arg0: i32) -> (i32, i32, i32) {
    %c0_i32 = arith.constant 0 : i32
    %c0_i32_0 = arith.constant 0 : i32
    %c0_i32_1 = arith.constant 0 : i32
    %c0_i32_2 = arith.constant 0 : i32
    return %c0_i32, %c0_i32_0, %c0_i32_1 : i32, i32, i32
  }
  func.func @transform_4(%arg0: i32) -> (i32, i32) {
    %c0_i32 = arith.constant 0 : i32
    %c0_i32_0 = arith.constant 0 : i32
    %c0_i32_1 = arith.constant 0 : i32
    return %c0_i32, %c0_i32_0 : i32, i32
  }
  func.func @transform_5(%arg0: i32) -> (i32, i32) {
    %c0_i32 = arith.constant 0 : i32
    %c0_i32_0 = arith.constant 0 : i32
    %c0_i32_1 = arith.constant 0 : i32
    return %c0_i32, %c0_i32_0 : i32, i32
  }
  func.func @transform_6(%arg0: i32) -> (i32, i32) {
    %c0_i32 = arith.constant 0 : i32
    %c0_i32_0 = arith.constant 0 : i32
    %c0_i32_1 = arith.constant 0 : i32
    return %c0_i32, %c0_i32_0 : i32, i32
  }
  func.func @transform_7(%arg0: i32) -> (i32, i32) {
    %c0_i32 = arith.constant 0 : i32
    %c0_i32_0 = arith.constant 0 : i32
    %c0_i32_1 = arith.constant 0 : i32
    return %c0_i32, %c0_i32_0 : i32, i32
  }
  func.func @transform_8(%arg0: i32) -> (i32, i32) {
    %c0_i32 = arith.constant 0 : i32
    %c0_i32_0 = arith.constant 0 : i32
    %c0_i32_1 = arith.constant 0 : i32
    return %c0_i32, %c0_i32_0 : i32, i32
  }
  func.func @transform_9(%arg0: i32) -> (i32, i32) {
    %c0_i32 = arith.constant 0 : i32
    %c0_i32_0 = arith.constant 0 : i32
    %c0_i32_1 = arith.constant 0 : i32
    return %c0_i32, %c0_i32_0 : i32, i32
  }
  func.func @transform_10(%arg0: i32) -> (i32, i32) {
    %c0_i32 = arith.constant 0 : i32
    %c0_i32_0 = arith.constant 0 : i32
    return %arg0, %c0_i32 : i32, i32
  }
  func.func @transform_11(%arg0: i32) -> (i32, i32) {
    %c0_i32 = arith.constant 0 : i32
    %c0_i32_0 = arith.constant 0 : i32
    return %arg0, %c0_i32 : i32, i32
  }
  func.func @transform_12(%arg0: i32) -> (i32, i32) {
    %c0_i32 = arith.constant 0 : i32
    %c0_i32_0 = arith.constant 0 : i32
    return %arg0, %c0_i32 : i32, i32
  }
  func.func @transform_13(%arg0: i32) -> (i32, i32, i32) {
    %c0_i32 = arith.constant 0 : i32
    %c0_i32_0 = arith.constant 0 : i32
    %c0_i32_1 = arith.constant 0 : i32
    return %arg0, %c0_i32, %c0_i32_0 : i32, i32, i32
  }
}

</mosaic_0001>

<bundles_post_ra>
// kernel: bimoa_forward.1
= control target key start
LH: loop header
LB: loop body
LE: loop exit
PB: predicated region body
PF: predicated region fallthrough
CT: control target
= control target key end

     0   :  { %19 = vsyncpa [#allocation3], 0  ;;  %s1305_s0 = inlined_call_operand.vmem [shape: bf16[16,128], index: 0, kind: input, shape index: {}]   ;;  %s1306_s1 = inlined_call_operand.vmem [shape: bf16[16,128], index: 1, kind: input, shape index: {}]   ;;  %s1307_s2 = inlined_call_operand.vmem [shape: f32[8,128], index: 2, kind: input, shape index: {}]   ;;  %s1308_s3 = inlined_call_operand.vmem [shape: bf16[2,128,32], index: 3, kind: input, shape index: {}]   ;;  %s1309_s4 = inlined_call_operand.vmem [shape: f32[2,32], index: 4, kind: input, shape index: {}]   ;;  %s1310_s5 = inlined_call_operand.vmem [shape: f32[32,4], index: 5, kind: input, shape index: {}]   ;;  %s1311_s6 = inlined_call_operand.vmem [shape: bf16[32,16], index: 6, kind: input, shape index: {}]   ;;  %s1312_s7 = inlined_call_operand.vmem [shape: f32[1,16], index: 7, kind: input, shape index: {}]   ;;  %s1313_s8 = inlined_call_operand.vmem [shape: f32[16,8], index: 8, kind: input, shape index: {}]   ;;  %s1314_s9 = inlined_call_operand.vmem [shape: f32[1,8], index: 9, kind: input, shape index: {}]   ;;  %s1315_s10 = inlined_call_operand.hbm [shape: bf16[16,128], index: 10, kind: output, shape index: {0}]   ;;  %s1316_s11 = inlined_call_operand.hbm [shape: bf16[16,128], index: 11, kind: output, shape index: {1}]   ;;  %s1317_s12 = inlined_call_operand.vmem [shape: f32[16,2], index: 12, kind: output, shape index: {2}]   ;;  %s1318_s13 = inlined_call_operand.vmem [shape: f32[1,2,4], index: 13, kind: output, shape index: {3}]  }
   0x1   :  { %v900_v0 = vld [vmem:[%s1306_s1] sm:$0xff]  }
   0x2   :  { %v896_v1 = vld [vmem:[%s1305_s0] sm:$0xff]   ;;  %v1095_v2 = vunpack.c.l.bf16 %v900_v0 }
   0x3   :  { %v1097_v3 = vunpack.c.l.bf16 %v896_v1 }
   0x4   :  { %20 = vsyncpa [#allocation5], 0  ;;  %55 = vadd.xlane.f32.xlu1 %v1095_v2  ;;  %v1101_v4 = vunpack.c.h.bf16 %v900_v0  ;;  %v1103_v5 = vunpack.c.h.bf16 %v896_v1  ;;  %v892_v22 = vld [vmem:[%s1308_s3 + $0x78] sm:$0xff]  ;;  %v891_v24 = vld [vmem:[%s1308_s3 + $0x70] sm:$0xff]  ;;  %vm281_vm6 = vcmask 261120   ;;  %vm373_vm14 = vcmask 31744  }
   0x5   :  { %51 = vadd.xlane.f32.xlu0 %v1097_v3  ;;  %v884_v23 = vld [vmem:[%s1308_s3 + $0x38] sm:$0xff]  ;;  %204 = vmatpush.bf16.msra.mxu0 %v892_v22  ;;  %v883_v25 = vld [vmem:[%s1308_s3 + $0x30] sm:$0xff]  ;;  %v890_v26 = vld [vmem:[%s1308_s3 + $0x68] sm:$0xff]  ;;  %vm591_vm15 = vcmask 130048   ;;  %s1013_s21 = smov 124   ;;  %s744_s23 = sshll.u32 %s1315_s10, 4  ;;  %s745_s23 = int_to_ptr.hbm [resolvable:$true] %s744_s23 }
   0x6   :  { %266 = vmatpush.bf16.msra.mxu1 %v884_v23  ;;  %v882_v27 = vld [vmem:[%s1308_s3 + $0x28] sm:$0xff]  ;;  %v889_v28 = vld [vmem:[%s1308_s3 + $0x60] sm:$0xff]  ;;  %v888_v30 = vld [vmem:[%s1308_s3 + $0x58] sm:$0xff]  ;;  %s1015_s25 = smov [#allocation2]   ;;  %s1016_s28 = smov [#allocation4]  }
   0x7   :  { %v881_v29 = vld [vmem:[%s1308_s3 + $0x20] sm:$0xff]  ;;  %v880_v31 = vld [vmem:[%s1308_s3 + $0x18] sm:$0xff]  ;;  %v887_v32 = vld [vmem:[%s1308_s3 + $0x50] sm:$0xff]  ;;  %s742_s26 = sshll.u32 %s1015_s25, 4  ;;  %s755_s0 = sshll.u32 %s1016_s28, 4  ;;  %s743_s26 = int_to_ptr.vmem [resolvable:$true] %s742_s26  ;;  %s756_s0 = int_to_ptr.vmem [resolvable:$true] %s755_s0 }
   0x8   :  { %v879_v33 = vld [vmem:[%s1308_s3 + $0x10] sm:$0xff]  ;;  %v886_v34 = vld [vmem:[%s1308_s3 + $0x48] sm:$0xff]  ;;  %v885_v39 = vld [vmem:[%s1308_s3 + $0x40] sm:$0xff]  ;;  %s757_s30 = sshll.u32 %s1316_s11, 4  ;;  %s1017_s14 = smov 64   ;;  %s758_s30 = int_to_ptr.hbm [resolvable:$true] %s757_s30 }
   0x9   :  { %205 = vmatpush.bf16.msra.mxu0 %v891_v24  ;;  %v878_v35 = vld [vmem:[%s1308_s3 + $0x8] sm:$0xff]  ;;  %v877_v40 = vld [vmem:[%s1308_s3] sm:$0xff]  ;;  %s1018_s15 = smov 4  }
   0xa   :  { %267 = vmatpush.bf16.msra.mxu1 %v883_v25  ;;  %v1178_v58 = vld [vmem:[%s1307_s2] sm:$0xff] }
   0xb   :  { %v116_v62 = vperm.slane %v1178_v58, 1  ;;  %v107_v0 = vperm.slane %v1178_v58, 0 }
   0xc   :  { %57 = vadd.xlane.f32.xlu1 %v1101_v4 }
   0xd   :  { %53 = vadd.xlane.f32.xlu0 %v1103_v5  ;;  %206 = vmatpush.bf16.msra.mxu0 %v890_v26 }
   0xe   :  { %268 = vmatpush.bf16.msra.mxu1 %v882_v27 }
  0x11   :  { %207 = vmatpush.bf16.msra.mxu0 %v889_v28 }
  0x12   :  { %269 = vmatpush.bf16.msra.mxu1 %v881_v29  ;;  %v1012_v29 = vmov 32.0  }
  0x15   :  { %208 = vmatpush.bf16.msra.mxu0 %v888_v30 }
  0x16   :  { %270 = vmatpush.bf16.msra.mxu1 %v880_v31 }
  0x19   :  { %209 = vmatpush.bf16.msra.mxu0 %v887_v32 }
  0x1a   :  { %271 = vmatpush.bf16.msra.mxu1 %v879_v33 }
  0x1d   :  { %210 = vmatpush.bf16.msra.mxu0 %v886_v34 }
  0x1e   :  { %272 = vmatpush.bf16.msra.mxu1 %v878_v35 }
  0x21   :  { %211 = vmatpush.bf16.msra.mxu0 %v885_v39 }
  0x22   :  { %273 = vmatpush.bf16.msra.mxu1 %v877_v40 }
  0x77   :  { %v56_v6 = vpop.xlane.xlu1 %55 }
  0x78   :  { %v52_v7 = vpop.xlane.xlu0 %51 }
  0x79   :  { %v59_v8 = vadd.f32 %v56_v6, %v52_v7  ;;  %v119_v7 = vperm.slane %v1178_v58, 3 }
  0x7b   :  { %v61_v9 = vmul.f32 0.00390625, %v59_v8  ;;  %v110_v8 = vperm.slane %v1178_v58, 2 }
  0x7d   :  { %v1108_v10 = vsub.f32 %v1095_v2, %v61_v9  ;;  %v1111_v11 = vsub.f32 %v1097_v3, %v61_v9 }
  0x7f   :  { %v73_v12 = vmul.f32 %v1108_v10, %v1108_v10  ;;  %v67_v13 = vmul.f32 %v1111_v11, %v1111_v11  ;;  %v58_v14 = vpop.xlane.xlu1 %57 }
  0x80   :  { %v54_v15 = vpop.xlane.xlu0 %53 }
  0x81   :  { %v60_v16 = vadd.f32 %v58_v14, %v54_v15  ;;  %75 = vadd.xlane.f32.xlu0 %v73_v12  ;;  %69 = vadd.xlane.f32.xlu2 %v67_v13 }
  0x83   :  { %v62_v17 = vmul.f32 0.00390625, %v60_v16 }
  0x85   :  { %v1118_v18 = vsub.f32 %v1103_v5, %v62_v17  ;;  %v1121_v19 = vsub.f32 %v1101_v4, %v62_v17 }
  0x87   :  { %v74_v20 = vmul.f32 %v1121_v19, %v1121_v19  ;;  %v68_v21 = vmul.f32 %v1118_v18, %v1118_v18 }
  0x89   :  { %77 = vadd.xlane.f32.xlu1 %v74_v20  ;;  %71 = vadd.xlane.f32.xlu2 %v68_v21 }
  0xf4   :  { %v70_v36 = vpop.xlane.xlu2 %69  ;;  %v76_v37 = vpop.xlane.xlu0 %75 }
  0xf5   :  { %v79_v38 = vadd.f32 %v76_v37, %v70_v36 }
  0xf7   :  { %v81_v41 = vmul.f32 0.00390625, %v79_v38 }
  0xf9   :  { %v83_v42 = vadd.f32 1e-05, %v81_v41 }
  0xfb   :  { %922 = vrsqrt.f32 %v83_v42  ;;  %vm91_vm1 = vweird.f32 %v83_v42 }
  0xfc   :  { %v78_v43 = vpop.xlane.xlu1 %77  ;;  %v72_v44 = vpop.xlane.xlu2 %71 }
  0xfd   :  { %v80_v45 = vadd.f32 %v78_v43, %v72_v44 }
  0xff   :  { %v82_v46 = vmul.f32 0.00390625, %v80_v45 }
 0x101   :  { %v923_v47 = vpop.eup %922  ;;  %v84_v48 = vadd.f32 1e-05, %v82_v46  ;;  %v343_v46 = vld [vmem:[%s1310_s5 + $0x18] sm:$0xff] }
 0x102   :  { %v86_v49 = vmul.f32 %v923_v47, %v83_v42  ;;  %vm92_vm0 = vweird.f32 %v923_v47  ;;  %362 = vmatpush.msra.mxu2 %v343_v46 }
 0x103   :  { %924 = vrsqrt.f32 %v84_v48  ;;  %vm93_vm2 = vmor %vm91_vm1, %vm92_vm0  ;;  %vm101_vm4 = vweird.f32 %v84_v48 }
 0x104   :  { %v87_v50 = vmul.f32 %v923_v47, %v86_v49  ;;  %926 = vrcp.f32 %v1012_v29  ;;  %v340_v49 = vld [vmem:[%s1310_s5] sm:$0xff] }
 0x106   :  { %v88_v51 = vmul.f32 0.5, %v87_v50  ;;  %v894_v50 = vld [vmem:[%s1311_s6 + $0x8] sm:$0xff] }
 0x107   :  { %579 = vmatpush.bf16.msra.mxu3 %v894_v50 }
 0x108   :  { %v89_v52 = vsub.f32 1.5, %v88_v51 }
 0x109   :  { %v925_v53 = vpop.eup %924 }
 0x10a   :  { %v90_v54 = vmul.f32 %v923_v47, %v89_v52  ;;  %v96_v55 = vmul.f32 %v925_v53, %v84_v48  ;;  %vm102_vm3 = vweird.f32 %v925_v53  ;;  %v927_v30 = vpop.eup %926  ;;  %v341_v48 = vld [vmem:[%s1310_s5 + $0x8] sm:$0xff]  ;;  %v893_v52 = vld [vmem:[%s1311_s6] sm:$0xff] }
 0x10b   :  { %vm103_vm5 = vmor %vm101_vm4, %vm102_vm3  ;;  %v289_v31 = vmul.f32 32.0, %v927_v30  ;;  %vm293_vm7 = vweird.f32 %v927_v30  ;;  %580 = vmatpush.bf16.msra.mxu3 %v893_v52 }
 0x10c   :  { %v97_v56 = vmul.f32 %v925_v53, %v96_v55  ;;  %v94_v59 = vsel %vm93_vm2, %v923_v47, %v90_v54  ;;  %v342_v47 = vld [vmem:[%s1310_s5 + $0x10] sm:$0xff] }
 0x10d   :  { %v114_v61 = vmul.f32 %v94_v59, %v1108_v10  ;;  %v105_v63 = vmul.f32 %v94_v59, %v1111_v11  ;;  %v290_v32 = vsub.f32 1.0, %v289_v31  ;;  %363 = vmatpush.msra.mxu2 %v342_v47 }
 0x10e   :  { %v98_v57 = vmul.f32 0.5, %v97_v56 }
 0x10f   :  { %v117_v12 = vmul.f32 %v116_v62, %v114_v61  ;;  %v108_v10 = vmul.f32 %v107_v0, %v105_v63  ;;  %v291_v33 = vmul.f32 %v927_v30, %v290_v32  ;;  %364 = vmatpush.msra.mxu2 %v341_v48 }
 0x110   :  { %v99_v60 = vsub.f32 1.5, %v98_v57 }
 0x111   :  { %v120_v16 = vadd.f32 %v119_v7, %v117_v12  ;;  %v111_v17 = vadd.f32 %v110_v8, %v108_v10  ;;  %v292_v34 = vadd.f32 %v927_v30, %v291_v33  ;;  %365 = vmatpush.msra.mxu2 %v340_v49 }
 0x112   :  { %v100_v1 = vmul.f32 %v925_v53, %v99_v60 }
 0x113   :  { %v294_v35 = vsel %vm293_vm7, %v927_v30, %v292_v34 }
 0x114   :  { %v104_v6 = vsel %vm103_vm5, %v925_v53, %v100_v1 }
 0x115   :  { %v115_v9 = vmul.f32 %v104_v6, %v1121_v19  ;;  %v106_v13 = vmul.f32 %v104_v6, %v1118_v18 }
 0x117   :  { %v118_v14 = vmul.f32 %v116_v62, %v115_v9  ;;  %v109_v15 = vmul.f32 %v107_v0, %v106_v13  ;;  %v280_v0 = vld [vmem:[%s1309_s4] sm:$0x3] }
 0x118   :  { %v336_v10 = vperm.slane %v280_v0, 1 }
 0x119   :  { %v121_v11 = vadd.f32 %v119_v7, %v118_v14  ;;  %v112_v20 = vadd.f32 %v110_v8, %v109_v15  ;;  %v333_v8 = vperm.slane %v280_v0, 0 }
 0x11b   :  { %v122_v21 = vpack.c.bf16 %v121_v11, %v120_v16  ;;  %v113_v22 = vpack.c.bf16 %v112_v20, %v111_v17 }
 0x11d   :  { %212 = vmatmul.bf16.vlgmr.msra.gmra.mxu0 %v122_v21  ;;  %274 = vmatmul.bf16.vlgmr.msra.gmra.mxu1 %v113_v22 }
 0x19a   :  { %v213_v23 = vpop.f32.mrf.mxu0  ;;  %v275_v24 = vpop.f32.mrf.mxu1 }
 0x19b   :  { %v276_v25 = vadd.f32 %v275_v24, %v213_v23 }
 0x19d   :  { %v282_v19 = vsel %vm281_vm6, %v276_v25, 0.0 }
 0x19e   :  { %283 = vadd.xlane.f32.xlu2 %v282_v19  ;;  %v589_v19 = vld [vmem:[%s1313_s8] sm:$0xff] }
 0x1a2   :  { %v215_v26 = vpop.f32.mrf.mxu0  ;;  %v277_v18 = vpop.f32.mrf.mxu1 }
 0x1a3   :  { %v278_v27 = vadd.f32 %v277_v18, %v215_v26 }
 0x1a5   :  { %v285_v28 = vsel %vm281_vm6, %v278_v27, 0.0 }
 0x1a6   :  { %286 = vadd.xlane.f32.xlu0 %v285_v28 }
 0x211   :  { %v284_v36 = vpop.xlane.xlu2 %283 }
 0x212   :  { %v295_v37 = vmul.f32 %v294_v35, %v284_v36 }
 0x214   :  { %v297_v38 = vsub.f32 %v276_v25, %v295_v37  ;;  %v590_v25 = vld [vmem:[%s1313_s8 + $0x8] sm:$0xff] }
 0x215   :  { %612 = vmatpush.msrb.mxu2 %v590_v25 }
 0x216   :  { %v299_v39 = vmul.f32 %v297_v38, %v297_v38 }
 0x217   :  { %613 = vmatpush.msrb.mxu2 %v589_v19 }
 0x218   :  { %v301_v40 = vsel %vm281_vm6, %v299_v39, 0.0 }
 0x219   :  { %v287_v41 = vpop.xlane.xlu0 %286  ;;  %302 = vadd.xlane.f32.xlu1 %v301_v40 }
 0x21a   :  { %v296_v42 = vmul.f32 %v294_v35, %v287_v41 }
 0x21c   :  { %v298_v43 = vsub.f32 %v278_v27, %v296_v42  ;;  %v920_v27 = vld [vmem:[%s1312_s7] ss:$0 sm:$0xff] }
 0x21e   :  { %v300_v44 = vmul.f32 %v298_v43, %v298_v43 }
 0x220   :  { %v304_v45 = vsel %vm281_vm6, %v300_v44, 0.0 }
 0x221   :  { %305 = vadd.xlane.f32.xlu2 %v304_v45 }
 0x28c   :  { %v303_v51 = vpop.xlane.xlu1 %302 }
 0x28d   :  { %v307_v53 = vmul.f32 %v303_v51, %v294_v35 }
 0x28f   :  { %v309_v54 = vadd.f32 1e-05, %v307_v53 }
 0x291   :  { %928 = vrsqrt.f32 %v309_v54  ;;  %vm317_vm9 = vweird.f32 %v309_v54 }
 0x294   :  { %v306_v55 = vpop.xlane.xlu2 %305 }
 0x295   :  { %v308_v56 = vmul.f32 %v306_v55, %v294_v35 }
 0x297   :  { %v929_v57 = vpop.eup %928  ;;  %v310_v59 = vadd.f32 1e-05, %v308_v56 }
 0x298   :  { %v312_v60 = vmul.f32 %v929_v57, %v309_v54  ;;  %vm318_vm8 = vweird.f32 %v929_v57 }
 0x299   :  { %930 = vrsqrt.f32 %v310_v59  ;;  %vm319_vm10 = vmor %vm317_vm9, %vm318_vm8  ;;  %vm327_vm12 = vweird.f32 %v310_v59 }
 0x29a   :  { %v313_v61 = vmul.f32 %v929_v57, %v312_v60 }
 0x29c   :  { %v314_v62 = vmul.f32 0.5, %v313_v61 }
 0x29e   :  { %v315_v63 = vsub.f32 1.5, %v314_v62 }
 0x29f   :  { %v931_v1 = vpop.eup %930 }
 0x2a0   :  { %v316_v6 = vmul.f32 %v929_v57, %v315_v63  ;;  %v322_v7 = vmul.f32 %v931_v1, %v310_v59  ;;  %vm328_vm11 = vweird.f32 %v931_v1 }
 0x2a1   :  { %vm329_vm13 = vmor %vm327_vm12, %vm328_vm11 }
 0x2a2   :  { %v320_v9 = vsel %vm319_vm10, %v929_v57, %v316_v6  ;;  %v323_v12 = vmul.f32 %v931_v1, %v322_v7 }
 0x2a3   :  { %v331_v13 = vmul.f32 %v320_v9, %v297_v38 }
 0x2a4   :  { %v324_v14 = vmul.f32 0.5, %v323_v12 }
 0x2a5   :  { %v334_v15 = vmul.f32 %v333_v8, %v331_v13 }
 0x2a6   :  { %v325_v16 = vsub.f32 1.5, %v324_v14  ;;  %v422_v14 = vlaneseq }
 0x2a7   :  { %v337_v11 = vadd.f32 %v336_v10, %v334_v15 }
 0x2a8   :  { %v326_v17 = vmul.f32 %v931_v1, %v325_v16  ;;  %v1237_v15 = vand.u32 127, %v422_v14 }
 0x2a9   :  { %862 = vmatmul.msk.f32.vlgmr.msra.gmra.mxu2 %vm281_vm6, %v337_v11 }
 0x2aa   :  { %v330_v20 = vsel %vm329_vm13, %v931_v1, %v326_v17 }
 0x2ab   :  { %v332_v21 = vmul.f32 %v330_v20, %v298_v43 }
 0x2ad   :  { %v335_v22 = vmul.f32 %v333_v8, %v332_v21 }
 0x2af   :  { %v338_v23 = vadd.f32 %v336_v10, %v335_v22 }
 0x2b1   :  { %863 = vmatmul.msk.f32.gmra.mxu2 %vm281_vm6, %v338_v23  ;;  %v339_v24 = vpack.c.bf16 %v338_v23, %v337_v11 }
 0x2b3   :  { %872 = vmatmul.msk.bf16.vlgmr.msra.gmra.mxu3 %vm281_vm6, %v339_v24 }
 0x32c   :  { %v367_v26 = vpop.f32.mrf.mxu2 }
 0x32d   :  { %v374_v18 = vsel %vm373_vm14, %v367_v26, -inf }
 0x32e   :  { %375 = vmax.xlane.f32.xlu0 %v374_v18 }
 0x334   :  { %v370_v28 = vpop.f32.mrf.mxu2 }
 0x335   :  { %v377_v29 = vsel %vm373_vm14, %v370_v28, -inf }
 0x336   :  { %378 = vmax.xlane.f32.xlu1 %v377_v29  ;;  %v582_v30 = vpop.f32.mrf.mxu3 }
 0x337   :  { %v583_v31 = vadd.f32 %v920_v27, %v582_v30 }
 0x339   :  { %v587_v32 = vmax.f32 %v583_v31, 0.0 }
 0x33b   :  { %873 = vmatmul.msk.f32.vlgmr.msrb.gmra.mxu2 %vm591_vm15, %v587_v32 }
 0x33e   :  { %v584_v33 = vpop.f32.mrf.mxu3 }
 0x33f   :  { %v585_v34 = vadd.f32 %v920_v27, %v584_v33 }
 0x341   :  { %v588_v35 = vmax.f32 %v585_v34, 0.0 }
 0x343   :  { %874 = vmatmul.msk.f32.gmra.mxu2 %vm591_vm15, %v588_v35 }
 0x3a1   :  { %v376_v36 = vpop.xlane.xlu0 %375 }
 0x3a2   :  { %v380_v37 = vsub.f32 %v367_v26, %v376_v36 }
 0x3a4   :  { %v382_v38 = vmul.f32 1.442695, %v380_v37 }
 0x3a6   :  { %932 = vpow2.f32 %v382_v38 }
 0x3a9   :  { %v379_v39 = vpop.xlane.xlu1 %378 }
 0x3aa   :  { %v381_v40 = vsub.f32 %v370_v28, %v379_v39 }
 0x3ac   :  { %v933_v41 = vpop.eup %932  ;;  %v384_v42 = vmul.f32 1.442695, %v381_v40 }
 0x3ad   :  { %v386_v43 = vsel %vm373_vm14, %v933_v41, 0.0 }
 0x3ae   :  { %934 = vpow2.f32 %v384_v42  ;;  %387 = vadd.xlane.f32.xlu2 %v386_v43 }
 0x3b4   :  { %v935_v44 = vpop.eup %934 }
 0x3b5   :  { %v389_v45 = vsel %vm373_vm14, %v935_v44, 0.0 }
 0x3b6   :  { %390 = vadd.xlane.f32.xlu0 %v389_v45 }
 0x421   :  { %v388_v46 = vpop.xlane.xlu2 %387 }
 0x422   :  { %936 = vrcp.f32 %v388_v46  ;;  %v403_v51 = vand.u32 2147483648, %v388_v46  ;;  %v401_v53 = vand.u32 2147483647, %v388_v46  ;;  %vm397_vm1 = vweird.f32 %v388_v46 }
 0x424   :  { %v404_v56 = vor.u32 1.1754944e-38, %v403_v51  ;;  %vm402_vm3 = vcmp.eq.f32.partialorder %v401_v53, 8.507059e+37 }
 0x428   :  { %v937_v47 = vpop.eup %936 }
 0x429   :  { %v393_v48 = vmul.f32 %v937_v47, %v388_v46  ;;  %v391_v49 = vpop.xlane.xlu0 %390  ;;  %vm398_vm0 = vweird.f32 %v937_v47 }
 0x42a   :  { %938 = vrcp.f32 %v391_v49  ;;  %vm399_vm2 = vmor %vm397_vm1, %vm398_vm0  ;;  %v418_v63 = vand.u32 2147483648, %v391_v49  ;;  %v416_v1 = vand.u32 2147483647, %v391_v49  ;;  %vm412_vm5 = vweird.f32 %v391_v49 }
 0x42b   :  { %v394_v50 = vsub.f32 1.0, %v393_v48 }
 0x42c   :  { %v419_v8 = vor.u32 1.1754944e-38, %v418_v63  ;;  %vm417_vm7 = vcmp.eq.f32.partialorder %v416_v1, 8.507059e+37 }
 0x42d   :  { %v395_v52 = vmul.f32 %v937_v47, %v394_v50 }
 0x42f   :  { %v396_v54 = vadd.f32 %v937_v47, %v395_v52 }
 0x430   :  { %v939_v55 = vpop.eup %938 }
 0x431   :  { %v408_v57 = vmul.f32 %v939_v55, %v391_v49  ;;  %v400_v59 = vsel %vm399_vm2, %v937_v47, %v396_v54  ;;  %vm413_vm4 = vweird.f32 %v939_v55 }
 0x432   :  { %v405_v60 = vsel %vm402_vm3, %v404_v56, %v400_v59  ;;  %vm414_vm6 = vmor %vm412_vm5, %vm413_vm4 }
 0x433   :  { %v409_v61 = vsub.f32 1.0, %v408_v57  ;;  %v1229_v62 = vmul.f32 %v933_v41, %v405_v60 }
 0x435   :  { %v410_v0 = vmul.f32 %v939_v55, %v409_v61  ;;  %v424_v6 = vsel %vm373_vm14, %v1229_v62, -inf }
 0x436   :  { %425 = vmax.xlane.f32.xlu1 %v424_v6 }
 0x437   :  { %v411_v7 = vadd.f32 %v939_v55, %v410_v0 }
 0x439   :  { %v415_v9 = vsel %vm414_vm6, %v939_v55, %v411_v7  ;;  %v921_v7 = vld [vmem:[%s1314_s9] ss:$0 sm:$0xff] }
 0x43a   :  { %v420_v12 = vsel %vm417_vm7, %v419_v8, %v415_v9  ;;  %v615_v8 = vpop.f32.mrf.mxu2 }
 0x43b   :  { %v1233_v13 = vmul.f32 %v935_v44, %v420_v12  ;;  %v625_v9 = vadd.f32 %v921_v7, %v615_v8 }
 0x43d   :  { %v427_v10 = vsel %vm373_vm14, %v1233_v13, -inf }
 0x43e   :  { %428 = vmax.xlane.f32.xlu2 %v427_v10 }
 0x4a9   :  { %v426_v16 = vpop.xlane.xlu1 %425 }
 0x4aa   :  { %vm430_vm8 = vcmp.eq.f32.partialorder %v1229_v62, %v426_v16 }
 0x4ab   :  { %v432_v11 = vsel %vm430_vm8, %v1237_v15, 4 }
 0x4ac   :  { %v434_v17 = vsel %vm373_vm14, %v432_v11, 2147483647 }
 0x4ad   :  { %v436_v20 = vshra.s32 %v434_v17, 16  ;;  %v435_v26 = vand.u32 65535, %v434_v17 }
 0x4af   :  { %v438_v21 = vcvt.s32.f32 %v436_v20  ;;  %v437_v27 = vcvt.s32.f32 %v435_v26 }
 0x4b1   :  { %439 = vmin.xlane.f32.xlu0 %v438_v21  ;;  %v429_v22 = vpop.xlane.xlu2 %428 }
 0x4b2   :  { %vm431_vm9 = vcmp.eq.f32.partialorder %v1233_v13, %v429_v22 }
 0x4b3   :  { %v433_v23 = vsel %vm431_vm9, %v1237_v15, 4 }
 0x4b4   :  { %v449_v24 = vsel %vm373_vm14, %v433_v23, 2147483647 }
 0x4b5   :  { %v451_v25 = vshra.s32 %v449_v24, 16  ;;  %v450_v29 = vand.u32 65535, %v449_v24 }
 0x4b7   :  { %v453_v19 = vcvt.s32.f32 %v451_v25  ;;  %v452_v31 = vcvt.s32.f32 %v450_v29 }
 0x4b9   :  { %454 = vmin.xlane.f32.xlu1 %v453_v19 }
 0x524   :  { %v440_v18 = vpop.xlane.xlu0 %439 }
 0x525   :  { %vm441_vm10 = vcmp.eq.f32.partialorder %v438_v21, %v440_v18  ;;  %v446_v33 = vcvt.f32.s32 %v440_v18  ;;  %v618_v18 = vpop.f32.mrf.mxu2 }
 0x526   :  { %v442_v28 = vsel %vm441_vm10, %v437_v27, inf  ;;  %v626_v27 = vadd.f32 %v921_v7, %v618_v18 }
 0x527   :  { %443 = vmin.xlane.f32.xlu2 %v442_v28  ;;  %v447_v35 = vshll.u32 %v446_v33, 16 }
 0x52c   :  { %v455_v30 = vpop.xlane.xlu1 %454 }
 0x52d   :  { %vm456_vm11 = vcmp.eq.f32.partialorder %v453_v19, %v455_v30  ;;  %v461_v38 = vcvt.f32.s32 %v455_v30 }
 0x52e   :  { %v457_v32 = vsel %vm456_vm11, %v452_v31, inf }
 0x52f   :  { %458 = vmin.xlane.f32.xlu0 %v457_v32  ;;  %v462_v42 = vshll.u32 %v461_v38, 16 }
 0x59a   :  { %v444_v34 = vpop.xlane.xlu2 %443 }
 0x59b   :  { %v445_v36 = vcvt.f32.s32 %v444_v34 }
 0x59d   :  { %v448_v37 = vadd.s32 %v447_v35, %v445_v36 }
 0x59f   :  { %vm464_vm12 = vcmp.eq.s32.totalorder %v1237_v15, %v448_v37 }
 0x5a0   :  { %v466_v39 = vsel %vm464_vm12, -1.0, %v1229_v62 }
 0x5a1   :  { %v468_v40 = vsel %vm373_vm14, %v466_v39, -inf }
 0x5a2   :  { %v459_v41 = vpop.xlane.xlu0 %458  ;;  %469 = vmax.xlane.f32.xlu1 %v468_v40 }
 0x5a3   :  { %v460_v43 = vcvt.f32.s32 %v459_v41 }
 0x5a5   :  { %v463_v44 = vadd.s32 %v462_v42, %v460_v43 }
 0x5a7   :  { %vm465_vm13 = vcmp.eq.s32.totalorder %v1237_v15, %v463_v44 }
 0x5a8   :  { %v467_v45 = vsel %vm465_vm13, -1.0, %v1233_v13 }
 0x5a9   :  { %v471_v46 = vsel %vm373_vm14, %v467_v45, -inf }
 0x5aa   :  { %472 = vmax.xlane.f32.xlu2 %v471_v46 }
 0x615   :  { %v470_v47 = vpop.xlane.xlu1 %469 }
 0x616   :  { %vm474_vm15 = vcmp.eq.f32.partialorder %v466_v39, %v470_v47 }
 0x617   :  { %v476_v48 = vsel %vm474_vm15, %v1237_v15, 4 }
 0x618   :  { %v478_v49 = vsel %vm373_vm14, %v476_v48, 2147483647 }
 0x619   :  { %v480_v50 = vshra.s32 %v478_v49, 16  ;;  %v479_v57 = vand.u32 65535, %v478_v49 }
 0x61b   :  { %v482_v51 = vcvt.s32.f32 %v480_v50  ;;  %v481_v60 = vcvt.s32.f32 %v479_v57 }
 0x61d   :  { %483 = vmin.xlane.f32.xlu0 %v482_v51  ;;  %v473_v52 = vpop.xlane.xlu2 %472 }
 0x61e   :  { %vm475_vm0 = vcmp.eq.f32.partialorder %v467_v45, %v473_v52  ;;  %v1014_v52 = vmov 0.0  }
 0x61f   :  { %v477_v53 = vsel %vm475_vm0, %v1237_v15, 4 }
 0x620   :  { %v493_v54 = vsel %vm373_vm14, %v477_v53, 2147483647 }
 0x621   :  { %v495_v55 = vshra.s32 %v493_v54, 16  ;;  %v494_v63 = vand.u32 65535, %v493_v54 }
 0x623   :  { %v497_v56 = vcvt.s32.f32 %v495_v55  ;;  %v496_v1 = vcvt.s32.f32 %v494_v63 }
 0x625   :  { %498 = vmin.xlane.f32.xlu1 %v497_v56 }
 0x690   :  { %v484_v59 = vpop.xlane.xlu0 %483 }
 0x691   :  { %vm485_vm1 = vcmp.eq.f32.partialorder %v482_v51, %v484_v59  ;;  %v490_v12 = vcvt.f32.s32 %v484_v59 }
 0x692   :  { %v486_v61 = vsel %vm485_vm1, %v481_v60, inf }
 0x693   :  { %487 = vmin.xlane.f32.xlu2 %v486_v61  ;;  %v491_v14 = vshll.u32 %v490_v12, 16 }
 0x698   :  { %v499_v0 = vpop.xlane.xlu1 %498 }
 0x699   :  { %vm500_vm2 = vcmp.eq.f32.partialorder %v497_v56, %v499_v0  ;;  %v505_v17 = vcvt.f32.s32 %v499_v0 }
 0x69a   :  { %v501_v6 = vsel %vm500_vm2, %v496_v1, inf  ;;  %vm734_vm2 = vcmask 1040384  }
 0x69b   :  { %502 = vmin.xlane.f32.xlu0 %v501_v6  ;;  %v506_v23 = vshll.u32 %v505_v17, 16 }
 0x6af   :  { %637 = vrot.lane.b32.xlu0 %v625_v9, %s1013_s21 }
 0x706   :  { %v488_v10 = vpop.xlane.xlu2 %487 }
 0x707   :  { %v489_v16 = vcvt.f32.s32 %v488_v10 }
 0x709   :  { %v492_v11 = vadd.s32 %v491_v14, %v489_v16 }
 0x70b   :  { %vm508_vm3 = vcmp.eq.s32.totalorder %v1237_v15, %v492_v11 }
 0x70c   :  { %vm510_vm4 = vmor %vm464_vm12, %vm508_vm3  ;;  %vm736_vm3 = vcmask 25600  }
 0x70d   :  { %v512_v20 = vsel %vm510_vm4, %v1229_v62, 0.0  ;;  %vm692_vm4 = vcmask 15360  }
 0x70e   :  { %v503_v21 = vpop.xlane.xlu0 %502  ;;  %v514_v22 = vsel %vm373_vm14, %v512_v20, 0.0 }
 0x70f   :  { %v504_v24 = vcvt.f32.s32 %v503_v21  ;;  %515 = vadd.xlane.f32.xlu1 %v514_v22 }
 0x711   :  { %v507_v25 = vadd.s32 %v506_v23, %v504_v24 }
 0x713   :  { %vm509_vm5 = vcmp.eq.s32.totalorder %v1237_v15, %v507_v25 }
 0x714   :  { %vm511_vm6 = vmor %vm465_vm13, %vm509_vm5 }
 0x715   :  { %v513_v19 = vsel %vm511_vm6, %v1233_v13, 0.0 }
 0x716   :  { %v517_v26 = vsel %vm373_vm14, %v513_v19, 0.0 }
 0x717   :  { %518 = vadd.xlane.f32.xlu2 %v517_v26 }
 0x721   :  { %v638_v8 = vpop.permute.xlu0 %637 }
 0x728   :  { %639 = vrot.lane.b32.xlu1 %v626_v27, %s1013_s21 }
 0x782   :  { %v516_v62 = vpop.xlane.xlu1 %515 }
 0x783   :  { %940 = vrcp.f32 %v516_v62  ;;  %v531_v32 = vand.u32 2147483648, %v516_v62  ;;  %v529_v15 = vand.u32 2147483647, %v516_v62  ;;  %vm525_vm8 = vweird.f32 %v516_v62 }
 0x785   :  { %v532_v35 = vor.u32 1.1754944e-38, %v531_v32  ;;  %vm530_vm10 = vcmp.eq.f32.partialorder %v529_v15, 8.507059e+37 }
 0x789   :  { %v941_v28 = vpop.eup %940 }
 0x78a   :  { %v521_v29 = vmul.f32 %v941_v28, %v516_v62  ;;  %v519_v30 = vpop.xlane.xlu2 %518  ;;  %vm526_vm7 = vweird.f32 %v941_v28 }
 0x78b   :  { %942 = vrcp.f32 %v519_v30  ;;  %vm527_vm9 = vmor %vm525_vm8, %vm526_vm7  ;;  %v546_v41 = vand.u32 2147483648, %v519_v30  ;;  %v544_v43 = vand.u32 2147483647, %v519_v30  ;;  %vm540_vm12 = vweird.f32 %v519_v30 }
 0x78c   :  { %v522_v31 = vsub.f32 1.0, %v521_v29 }
 0x78d   :  { %v547_v47 = vor.u32 1.1754944e-38, %v546_v41  ;;  %vm545_vm15 = vcmp.eq.f32.partialorder %v544_v43, 8.507059e+37 }
 0x78e   :  { %v523_v33 = vmul.f32 %v941_v28, %v522_v31 }
 0x790   :  { %v524_v34 = vadd.f32 %v941_v28, %v523_v33 }
 0x791   :  { %v943_v13 = vpop.eup %942 }
 0x792   :  { %v528_v36 = vsel %vm527_vm9, %v941_v28, %v524_v34  ;;  %v536_v37 = vmul.f32 %v943_v13, %v519_v30  ;;  %vm541_vm11 = vweird.f32 %v943_v13 }
 0x793   :  { %v533_v38 = vsel %vm530_vm10, %v532_v35, %v528_v36  ;;  %vm542_vm13 = vmor %vm540_vm12, %vm541_vm11 }
 0x794   :  { %v537_v39 = vsub.f32 1.0, %v536_v37  ;;  %v534_v40 = vmul.f32 %v533_v38, %v512_v20 }
 0x796   :  { %v538_v42 = vmul.f32 %v943_v13, %v537_v39  ;;  %v627_v44 = vmul.f32 %v625_v9, %v534_v40  ;;  %vm719_vm0 = vcmp.gt.f32.partialorder %v534_v40, 0.0  ;;  %v710_v51 = vsel %vm373_vm14, %v534_v40, 0.0 }
 0x797   :  { %v875_v53 = vsel %vm719_vm0, 1.0, %v1014_v52  ;;  %v643_v10 = vmul.f32 %v638_v8, %v534_v40 }
 0x798   :  { %v539_v45 = vadd.f32 %v943_v13, %v538_v42  ;;  %v629_v46 = vsel %vm373_vm14, %v627_v44, 0.0  ;;  %v725_v61 = vsel %vm373_vm14, %v875_v53, 0.0 }
 0x799   :  { %630 = vadd.xlane.f32.xlu2 %v629_v46  ;;  %v645_v20 = vsel %vm373_vm14, %v643_v10, 0.0 }
 0x79a   :  { %v543_v48 = vsel %vm542_vm13, %v943_v13, %v539_v45  ;;  %v640_v54 = vpop.permute.xlu1 %639  ;;  %v673_v45 = vperm.slane %v1178_v58, 4 }
 0x79b   :  { %v548_v49 = vsel %vm545_vm15, %v547_v47, %v543_v48 }
 0x79c   :  { %v549_v50 = vmul.f32 %v548_v49, %v513_v19 }
 0x79e   :  { %v644_v55 = vmul.f32 %v640_v54, %v549_v50  ;;  %v711_v56 = vsel %vm373_vm14, %v549_v50, 0.0  ;;  %vm720_vm1 = vcmp.gt.f32.partialorder %v549_v50, 0.0  ;;  %v628_v57 = vmul.f32 %v626_v27, %v549_v50 }
 0x79f   :  { %v712_v59 = vadd.f32 %v711_v56, %v710_v51  ;;  %v876_v60 = vsel %vm720_vm1, 1.0, %v1014_v52 }
 0x7a0   :  { %v726_v63 = vsel %vm373_vm14, %v876_v60, 0.0  ;;  %v648_v0 = vsel %vm373_vm14, %v644_v55, 0.0  ;;  %v632_v1 = vsel %vm373_vm14, %v628_v57, 0.0  ;;  %vm689_vm14 = vcmask 7168  }
 0x7a1   :  { %v713_v6 = vrot.slane %v712_v59, 4  ;;  %v727_v7 = vadd.f32 %v726_v63, %v725_v61  ;;  %649 = vadd.xlane.f32.xlu0 %v648_v0  ;;  %633 = vadd.xlane.f32.xlu2 %v632_v1 }
 0x7a3   :  { %v714_v9 = vadd.f32 %v713_v6, %v712_v59  ;;  %v728_v12 = vrot.slane %v727_v7, 4 }
 0x7a5   :  { %v715_v14 = vrot.slane %v714_v9, 2  ;;  %v729_v16 = vadd.f32 %v728_v12, %v727_v7 }
 0x7a7   :  { %v716_v11 = vadd.f32 %v715_v14, %v714_v9  ;;  %v730_v17 = vrot.slane %v729_v16, 2 }
 0x7a9   :  { %v717_v21 = vrot.slane %v716_v11, 1  ;;  %v731_v22 = vadd.f32 %v730_v17, %v729_v16  ;;  %646 = vadd.xlane.f32.xlu2 %v645_v20 }
 0x7ab   :  { %v732_v23 = vrot.slane %v731_v22, 1  ;;  %v718_v24 = vadd.f32 %v717_v21, %v716_v11 }
 0x7ad   :  { %v733_v25 = vadd.f32 %v732_v23, %v731_v22 }
 0x7af   :  { %v735_v19 = vsel %vm734_vm2, %v718_v24, %v733_v25 }
 0x7b0   :  { %737 = vst.msk [vmem:[%s1318_s13] sm:$0x3] %vm736_vm3, %v735_v19 }
 0x80c   :  { %v631_v26 = vpop.xlane.xlu2 %630 }
 0x80d   :  { %v651_v18 = vsub.f32 0.0, %v631_v26 }
 0x80f   :  { %v653_v27 = vmul.f32 1.442695, %v651_v18 }
 0x811   :  { %944 = vpow2.f32 %v653_v27 }
 0x814   :  { %v650_v62 = vpop.xlane.xlu0 %649  ;;  %v634_v28 = vpop.xlane.xlu2 %633 }
 0x815   :  { %v662_v29 = vsub.f32 0.0, %v650_v62  ;;  %v652_v30 = vsub.f32 0.0, %v634_v28 }
 0x817   :  { %v665_v31 = vmul.f32 1.442695, %v662_v29  ;;  %v655_v32 = vmul.f32 1.442695, %v652_v30  ;;  %v945_v33 = vpop.eup %944 }
 0x818   :  { %v657_v15 = vadd.f32 1.0, %v945_v33 }
 0x819   :  { %946 = vpow2.f32 %v665_v31 }
 0x81a   :  { %948 = vpow2.f32 %v655_v32 }
 0x81b   :  { %950 = vrcp.f32 %v657_v15 }
 0x81c   :  { %v647_v34 = vpop.xlane.xlu2 %646 }
 0x81d   :  { %v661_v13 = vsub.f32 0.0, %v647_v34 }
 0x81f   :  { %v947_v35 = vpop.eup %946  ;;  %v663_v36 = vmul.f32 1.442695, %v661_v13 }
 0x820   :  { %v668_v37 = vadd.f32 1.0, %v947_v35  ;;  %v949_v38 = vpop.eup %948 }
 0x821   :  { %952 = vpow2.f32 %v663_v36  ;;  %v658_v39 = vadd.f32 1.0, %v949_v38  ;;  %v951_v40 = vpop.eup %950 }
 0x822   :  { %954 = vrcp.f32 %v668_v37  ;;  %v671_v44 = vmul.f32 %v951_v40, %v1097_v3 }
 0x823   :  { %956 = vrcp.f32 %v658_v39 }
 0x824   :  { %v674_v3 = vadd.f32 %v673_v45, %v671_v44 }
 0x827   :  { %v953_v41 = vpop.eup %952 }
 0x828   :  { %v955_v42 = vpop.eup %954  ;;  %v667_v43 = vadd.f32 1.0, %v953_v41 }
 0x829   :  { %v957_v46 = vpop.eup %956  ;;  %v681_v50 = vmul.f32 %v955_v42, %v1101_v4 }
 0x82a   :  { %958 = vrcp.f32 %v667_v43  ;;  %v691_v47 = vsel %vm689_vm14, %v957_v46, %v955_v42  ;;  %v672_v48 = vmul.f32 %v957_v46, %v1103_v5  ;;  %v682_v5 = vperm.slane %v1178_v58, 5 }
 0x82b   :  { %694 = vst.msk [vmem:[%s1317_s12 + $0x8] sm:$0xff] %vm692_vm4, %v691_v47 }
 0x82c   :  { %v675_v49 = vadd.f32 %v673_v45, %v672_v48  ;;  %v684_v58 = vadd.f32 %v682_v5, %v681_v50 }
 0x82e   :  { %v906_v51 = vpack.c.bf16 %v675_v49, %v674_v3 }
 0x830   :  { %v959_v52 = vpop.eup %958  ;;  %907 = vst [vmem:[#allocation2] sm:$0xff] %v906_v51  }
 0x831   :  { %v680_v53 = vmul.f32 %v959_v52, %v1095_v2  ;;  %v690_v54 = vsel %vm689_vm14, %v951_v40, %v959_v52  ;;  %750 = dma.vmem_to_hbm [thread:$0]  %s743_s26, 128, %s745_s23, [#allocation3], %s1017_s14, %s1017_s14, %s1018_s15  }
 0x832   :  { %693 = vst.msk [vmem:[%s1317_s12] sm:$0xff] %vm692_vm4, %v690_v54 }
 0x833   :  { %v683_v4 = vadd.f32 %v682_v5, %v680_v53 }
 0x835   :  { %v911_v2 = vpack.c.bf16 %v684_v58, %v683_v4 }
 0x837   :  { %912 = vst [vmem:[#allocation4] sm:$0xff] %v911_v2  }
 0x838   :  { %763 = dma.vmem_to_hbm [thread:$0]  %s756_s0, 128, %s758_s30, [#allocation5], %s1017_s14, %s1017_s14, %s1018_s15  }
 0x839   :  { %1008 = dma.done.wait [#allocation3], 128  }
 0x83a   :  { %1009 = vsyncadd [#allocation3], 4294967168 }
 0x83b   :  { %1010 = dma.done.wait [#allocation5], 128  }
 0x83c   :  { %1011 = vsyncadd [#allocation5], 4294967168 }
 0x83d   :  { %780 = vsyncpa [#allocation3], 1 }
 0x83e   :  { %781 = vsyncpa [#allocation5], 1 }

</bundles_post_ra>
